<compile_context>
chip_gen: v7x
topology: tpu7x:2x2x1
jax: 0.10.0
libtpu: 0.0.40
codegen_flags: <defaults>
</compile_context>

<pallas_src>
import math

import jax
import jax.numpy as jnp
from jax.experimental import pallas as pl
from jax.experimental.pallas import tpu as pltpu


def _copy_kernel(x_ref, o_ref):
    # Identity copy of one contiguous slab of the flattened tensor.
    o_ref[...] = x_ref[...]


def _target_block_bytes():
    """Generation-aware block-size target (bytes per buffer)."""
    try:
        kind = jax.devices()[0].device_kind.lower()
    except Exception:
        return 2 * 1024 * 1024
    # v6e / v7x: 32 MiB scoped-VMEM default -> ~4 MiB blocks
    # (in + out, double-buffered = 16 MiB, comfortable headroom).
    if "v6" in kind or "v7" in kind:
        return 4 * 1024 * 1024
    # v5e (16 MiB scoped default) and anything unknown: stay at ~2 MiB.
    return 2 * 1024 * 1024


def flatten_forward(x, materialize=False):
    """Equivalent of Flatten.forward: (N, d1, d2, ...) -> (N, d1*d2*...).

    materialize=False (production default): zero-cost metadata reshape.
    materialize=True: copy the flattened buffer with a Pallas kernel at
    HBM-roofline bandwidth.
    """
    n = x.shape[0]
    feat = math.prod(x.shape[1:]) if x.ndim > 1 else 1
    total = n * feat
    itemsize = jnp.dtype(x.dtype).itemsize
    sublane = max(8, 32 // itemsize)  # 8 for f32, 16 for bf16, 32 for int8/fp8

    # Metadata-only collapse: identical to torch .view on a contiguous tensor.
    x2d = x.reshape(n, feat)
    if not materialize:
        return x2d

    block_bytes = _target_block_bytes()
    cost = pl.CostEstimate(flops=0, transcendentals=0,
                           bytes_accessed=2 * total * itemsize)

    if total % 128 == 0:
        # ---- Main path: re-view the buffer as contiguous lane-dense slabs.
        lane = None
        for cand in (2048, 1024, 512, 256, 128):
            if total % cand == 0 and (total // cand) >= sublane:
                lane = cand
                break
        if lane is None:  # tiny tensors: fewer than `sublane` rows at any width
            for cand in (2048, 1024, 512, 256, 128):
                if total % cand == 0:
                    lane = cand
                    break
        rows = total // lane

        block_rows = min(rows, max(1, block_bytes // (lane * itemsize)))
        if block_rows >= sublane:
            block_rows -= block_rows % sublane  # dtype-aware full sublanes

        # Ensure >= 2 grid steps when possible so "parallel" can shard the
        # copy across both TensorCores on v7x (no-op on v5e/v6e).
        if pl.cdiv(rows, block_rows) == 1 and rows >= 2 * sublane:
            half = block_rows // 2
            half -= half % sublane
            block_rows = max(sublane, half)

        # Prefer a nearby divisor of rows (within ~25%) over a masked edge.
        if block_rows >= sublane and rows % block_rows != 0:
            lo = max(sublane, (int(block_rows * 0.75) // sublane) * sublane)
            for cand in range(block_rows, lo - 1, -sublane):
                if rows % cand == 0:
                    block_rows = cand
                    break

        grid = (pl.cdiv(rows, block_rows),)
        xflat = x2d.reshape(rows, lane)  # still metadata-only, same bytes
        out = pl.pallas_call(
            _copy_kernel,
            out_shape=jax.ShapeDtypeStruct((rows, lane), x.dtype),
            grid_spec=pltpu.PrefetchScalarGridSpec(
                num_scalar_prefetch=0,
                grid=grid,
                in_specs=[pl.BlockSpec((block_rows, lane), lambda i: (i, 0))],
                out_specs=pl.BlockSpec((block_rows, lane), lambda i: (i, 0)),
            ),
            compiler_params=pltpu.CompilerParams(
                dimension_semantics=("parallel",),
            ),
            cost_estimate=cost,
        )(xflat)
        return out.reshape(n, feat)

    # ---- Fallback: total element count not a multiple of 128.
    # 2-D grid over (row blocks, feature tiles): both block dims are bounded,
    # so VMEM stays within budget for any batch size and pipelining stays on.
    if feat < 128:
        tile_f = feat                                  # full (last-dim) extent
    else:
        tile_f = min((feat // 128) * 128, 1024)        # lane-dense, edge masked

    row_budget = max(1, block_bytes // (tile_f * itemsize))
    if n <= row_budget:
        block_n = n                                    # full (batch) extent
    else:
        block_n = min(n, max(sublane, (row_budget // sublane) * sublane))

    grid = (pl.cdiv(n, block_n), pl.cdiv(feat, tile_f))
    out = pl.pallas_call(
        _copy_kernel,
        out_shape=jax.ShapeDtypeStruct((n, feat), x.dtype),
        grid_spec=pltpu.PrefetchScalarGridSpec(
            num_scalar_prefetch=0,
            grid=grid,
            in_specs=[pl.BlockSpec((block_n, tile_f), lambda i, j: (i, j))],
            out_specs=pl.BlockSpec((block_n, tile_f), lambda i, j: (i, j)),
        ),
        compiler_params=pltpu.CompilerParams(
            dimension_semantics=("parallel", "parallel"),
        ),
        cost_estimate=cost,
    )(x2d)
    return out


if __name__ == "__main__":
    key = jax.random.PRNGKey(0)

    # Small shapes consistent with a conv-style NCHW input.
    N, C, H, W = 2, 4, 16, 16
    x = jax.random.normal(key, (N, C, H, W), dtype=jnp.float32)

    # Materialized copy through the Pallas kernel (main lane-dense path).
    y = flatten_forward(x, materialize=True)
    y = jax.block_until_ready(y)

    ref = jnp.reshape(x, (N, C * H * W))
    assert y.shape == (N, C * H * W), y.shape
    assert y.dtype == x.dtype
    assert bool(jnp.array_equal(y, ref)), "Pallas flatten mismatch vs reference"

    # Production (zero-cost view) path gives the same result.
    y_view = flatten_forward(x, materialize=False)
    assert bool(jnp.array_equal(y_view, ref))

    # Exercise the fallback path (feature count not a multiple of 128).
    key2 = jax.random.PRNGKey(0)
    x_odd = jax.random.normal(key2, (2, 3, 5, 5), dtype=jnp.float32)
    y_odd = jax.block_until_ready(flatten_forward(x_odd, materialize=True))
    ref_odd = jnp.reshape(x_odd, (2, 3 * 5 * 5))
    assert bool(jnp.array_equal(y_odd, ref_odd)), "fallback flatten mismatch"

    print("KERNEL_OK")
</pallas_src>

<mosaic_0001>
module attributes {stable_mosaic.version = 11 : i64} {
  func.func @_copy_kernel(%arg0: i32, %arg1: memref<8x256xf32, #tpu.memory_space<vmem>>, %arg2: memref<8x256xf32, #tpu.memory_space<vmem>>) attributes {dimension_semantics = [#tpu.dimension_semantics<parallel>], iteration_bounds = array<i64: 1>, scalar_prefetch = 0 : i64, scratch_operands = 0 : i64, tpu.core_type = #tpu.core_type<tc>, window_params = [{transform_indices = @transform_0, window_bounds = array<i64: 8, 256>}, {transform_indices = @transform_1, window_bounds = array<i64: 8, 256>}]} {
    %c0 = arith.constant 0 : index
    %c0_0 = arith.constant 0 : index
    %0 = vector.load %arg1[%c0, %c0_0] : memref<8x256xf32, #tpu.memory_space<vmem>>, vector<8x256xf32>
    %c0_1 = arith.constant 0 : index
    %c0_2 = arith.constant 0 : index
    %1 = vector.load %arg2[%c0_1, %c0_2] : memref<8x256xf32, #tpu.memory_space<vmem>>, vector<8x256xf32>
    tpu.vector_store %arg2[%c0_1, %c0_2], %0 {strides = array<i32>} : memref<8x256xf32, #tpu.memory_space<vmem>>, vector<8x256xf32>,
    return
  }
  func.func @transform_0(%arg0: i32) -> (i32, i32) {
    %c0_i32 = arith.constant 0 : i32
    %c0_i32_0 = arith.constant 0 : i32
    return %arg0, %c0_i32 : i32, i32
  }
  func.func @transform_1(%arg0: i32) -> (i32, i32) {
    %c0_i32 = arith.constant 0 : i32
    %c0_i32_0 = arith.constant 0 : i32
    return %arg0, %c0_i32 : i32, i32
  }
}

</mosaic_0001>

<bundles_post_ra>
// kernel: tpu_custom_call.1
= control target key start
LH: loop header
LB: loop body
LE: loop exit
PB: predicated region body
PF: predicated region fallthrough
CT: control target
= control target key end

     0   :  { %6 = vsyncpa [#allocation3], 0  ;;  %s126_s0 = inlined_call_operand.hbm [shape: f32[8,256], index: 0, kind: input, shape index: {}]   ;;  %s127_s1 = inlined_call_operand.hbm [shape: f32[8,256], index: 1, kind: output, shape index: {}]  }
   0x1   :  { %7 = vsyncpa [#allocation4], 0  ;;  %s90_s6 = smov [#allocation2]   ;;  %s42_s10 = scalar_lea.hbm %s126_s0, 256 }
   0x2   :  { %s14_s7 = sshll.u32 %s90_s6, 4  ;;  %p43_p0 = scmp.ne.s32.totalorder %s126_s0, %s42_s10  ;;  %s15_s7 = int_to_ptr.vmem [resolvable:$true] %s14_s7 }
   0x3   :  { %p46_p1 = scmp.lt.u32.totalorder %s42_s10, %s126_s0 }
   0x5   :  { %p48_p2 = pnand %p46_p1, %p43_p0 }
   0x7   :  { %51 = shalt.err (!%p48_p2)
}
   0x8   :  { %s52_s15 = scalar_lea.vmem %s15_s7, 256  ;;  %p57_p4 = scmp.lt.s32.totalorder %s15_s7, %s15_s7 }
   0x9   :  { %p53_p3 = scmp.ne.s32.totalorder %s15_s7, %s52_s15  ;;  %p58_p5 = scmp.lt.s32.totalorder %s52_s15, %s52_s15 }
   0xb   :  { %p59_p6 = por %p58_p5, %p57_p4 }
   0xd   :  { %p60_p7 = pnand %p59_p6, %p53_p3 }
   0xf   :  { %63 = shalt.err (!%p60_p7)
}
  0x10   :  { %17 = dma.hbm_to_vmem [thread:$0]  %s126_s0, 256, %s15_s7, [#allocation3]  }
  0x11   :  { %86 = dma.done.wait [#allocation3], 256  }
  0x12   :  { %87 = vsyncadd [#allocation3], 4294967040  ;;  %s91_s18 = smov [#allocation5]   ;;  %v21_v0 = vld [vmem:[#allocation2] sm:$0xff]  ;;  %v22_v1 = vld [vmem:[#allocation2 + $0x8] sm:$0xff] }
  0x13   :  { %s31_s19 = sshll.u32 %s91_s18, 4  ;;  %23 = vst [vmem:[#allocation5] sm:$0xff] %v21_v0  ;;  %24 = vst [vmem:[#allocation5 + $0x8] sm:$0xff] %v22_v1  ;;  %s32_s19 = int_to_ptr.vmem [resolvable:$true] %s31_s19 }
  0x14   :  { %s64_s20 = scalar_lea.vmem %s32_s19, 256  ;;  %p69_p9 = scmp.lt.s32.totalorder %s32_s19, %s32_s19 }
  0x15   :  { %p65_p8 = scmp.ne.s32.totalorder %s32_s19, %s64_s20  ;;  %p70_p10 = scmp.lt.s32.totalorder %s64_s20, %s64_s20 }
  0x17   :  { %p71_p11 = por %p70_p10, %p69_p9 }
  0x19   :  { %p72_p12 = pnand %p71_p11, %p65_p8 }
  0x1b   :  { %75 = shalt.err (!%p72_p12)
}
  0x1c   :  { %s76_s0 = scalar_lea.hbm %s127_s1, 256 }
  0x1d   :  { %p77_p13 = scmp.ne.s32.totalorder %s127_s1, %s76_s0  ;;  %p80_p0 = scmp.lt.u32.totalorder %s76_s0, %s127_s1 }
  0x1f   :  { %p82_p1 = pnand %p80_p0, %p77_p13 }
  0x21   :  { %85 = shalt.err (!%p82_p1)
}
  0x22   :  { %34 = dma.vmem_to_hbm [thread:$0]  %s32_s19, 256, %s127_s1, [#allocation4]  }
  0x23   :  { %88 = dma.done.wait [#allocation4], 256  }
  0x24   :  { %89 = vsyncadd [#allocation4], 4294967040 }
  0x25   :  { %38 = vsyncpa [#allocation3], 1 }
  0x26   :  { %39 = vsyncpa [#allocation4], 1 }

</bundles_post_ra>
